<compile_context>
chip_gen: v6e
topology: v6e:2x2x1
jax: 0.10.0
libtpu: 0.0.40
codegen_flags: <defaults>
</compile_context>

<pallas_src>
import functools

import jax
import jax.numpy as jnp
from jax.experimental import pallas as pl
from jax.experimental.pallas import tpu as pltpu


def _focus_double_kernel(x_ref, w_ref, p_ref, bias_ref, o_ref, *, bs):
    # x_ref:    (1, C, TH*bs, W)    input tile, native NCHW layout
    # w_ref:    (Cout, C*bs*bs)     1x1 conv weight with BN scale pre-folded, x.dtype
    # p_ref:    (W, W)              0/1 lane-permutation matrix (wb*bs+j -> j*Wb+wb)
    # bias_ref: (Cout, 1)           folded BN bias = beta - mean * scale   (f32)
    # o_ref:    (1, Cout, TH*Wb)    output tile, lane-dense flattened spatial
    _, C, th_bs, W = x_ref.shape
    TH = th_bs // bs
    Wb = W // bs
    Cout = o_ref.shape[1]

    # ---- Space2Depth stage 1: lane de-interleave on the MXU (otherwise idle) ----
    # Column w = wb*bs + j  ->  j*Wb + wb.  Exact: P is a 0/1 permutation matrix.
    x2 = x_ref[...].reshape(C * th_bs, W)
    xp = jnp.dot(x2, p_ref[...])                       # (C*TH*bs, W), lanes = (j, wb)

    # ---- Space2Depth stage 2: sublane-side regroup + (hb, wb) lane flatten -------
    # (C, TH, bs_i, bs_j, Wb) -> (bs_i, bs_j, C, TH, Wb) -> (bs*bs*C, TH*Wb)
    # Row order (i*bs + j)*C + c matches PyTorch's permute(0, 3, 5, 1, 2, 4).
    xp = xp.reshape(C, TH, bs, bs, Wb)
    feat = jnp.transpose(xp, (2, 3, 0, 1, 4)).reshape(bs * bs * C, TH * Wb)

    # ---- 1x1 conv (BN scale folded into w) on the MXU, f32 accumulation ----------
    acc = jnp.dot(w_ref[...], feat, preferred_element_type=jnp.float32)  # (Cout, TH*Wb)

    # ---- BN bias + Hardswish, lane-dense store ------------------------------------
    y = acc + bias_ref[...]
    y = y * jnp.clip(y + 3.0, 0.0, 6.0) * (1.0 / 6.0)
    o_ref[...] = y.reshape(1, Cout, TH * Wb).astype(o_ref.dtype)


def _valid_row_tiles(Hb, Wb, bs, itemsize):
    """Divisors TH of Hb whose input block (TH*bs sublanes) and output block
    (TH*Wb lanes) satisfy the dtype-aware (8/16/32, 128) tiling, or are full-extent."""
    sub = 32 // itemsize        # 8 for f32, 16 for bf16, 32 for int8/fp8
    def ok(d):
        return d == Hb or ((d * bs) % sub == 0 and (d * Wb) % 128 == 0)
    return sorted(d for d in range(1, Hb + 1) if Hb % d == 0 and ok(d))


def _block_bytes(th, C, Cout, W, Wb, bs, itemsize):
    """Per-grid-step VMEM footprint: double-buffered in/out blocks + in-kernel temps."""
    in_b = C * th * bs * W * itemsize
    out_b = Cout * th * Wb * itemsize
    inter = 2 * C * bs * bs * th * Wb * itemsize + 2 * Cout * th * Wb * 4  # xp/feat + acc/y
    return 2 * (in_b + out_b) + inter


def focus_double(x, conv_w, bn_gamma, bn_beta, bn_mean, bn_var, *,
                 block_size, eps=1e-5):
    """Fused FocusDouble.forward.

    x:       (N, C, H, W)                  NCHW input
    conv_w:  (Cout, C*block_size**2)       the (Cout, Cin*bs^2, 1, 1) conv weight, flattened
    bn_*:    (Cout,)                       BatchNorm2d affine params / running stats
    returns  (N, Cout, H//bs, W//bs)       NCHW output
    """
    N, C, H, W = x.shape
    bs = block_size
    assert H % bs == 0 and W % bs == 0
    Hb, Wb = H // bs, W // bs
    Kc = C * bs * bs
    Cout = conv_w.shape[0]
    assert conv_w.shape == (Cout, Kc)

    # TODO(synk): BatchNorm implemented in inference mode (running stats folded into the
    # conv weight / a per-channel bias); train-mode batch-statistic updates are not done here.
    scale = bn_gamma.astype(jnp.float32) / jnp.sqrt(bn_var.astype(jnp.float32) + eps)
    bias = (bn_beta.astype(jnp.float32) - bn_mean.astype(jnp.float32) * scale)
    bias = bias.reshape(Cout, 1)                                   # stays f32 in-kernel
    w_scaled = (conv_w.astype(jnp.float32) * scale[:, None]).astype(x.dtype)

    # Lane-permutation matrix for the s2d de-interleave: column wb*bs + j -> j*Wb + wb.
    col = jnp.arange(W)
    perm = (col % bs) * Wb + (col // bs)
    P = (perm[:, None] == jnp.arange(W)[None, :]).astype(x.dtype)  # (W, W), 0/1

    itemsize = jnp.dtype(x.dtype).itemsize

    # Generation-aware VMEM budget (v7x has 64 MiB/TC vs 128 MiB on v5e/v6e).
    try:
        vmem_cap = int(pltpu.get_tpu_info().vmem_capacity_bytes)
    except Exception:
        vmem_cap = 64 << 20                                        # conservative fallback
    budget = (8 << 20) if vmem_cap <= (64 << 20) else (12 << 20)

    cands = _valid_row_tiles(Hb, Wb, bs, itemsize)
    fitting = [d for d in cands if _block_bytes(d, C, Cout, W, Wb, bs, itemsize) <= budget]
    TH = max(fitting) if fitting else min(cands)
    # v7x has 2 TensorCores: keep >= 2 parallel blocks when the batch alone can't provide them.
    if N == 1 and Hb // TH <= 1:
        smaller = ([d for d in fitting if Hb // d >= 2]
                   or [d for d in cands if Hb // d >= 2])
        if smaller:
            TH = max(smaller)
    n_h = Hb // TH

    const_bytes = (Cout * Kc + W * W) * itemsize + Cout * 4
    needed = _block_bytes(TH, C, Cout, W, Wb, bs, itemsize) + 2 * const_bytes + (4 << 20)
    vmem_limit = int(min(3 * vmem_cap // 4, max(needed, 32 << 20)))

    kernel = functools.partial(_focus_double_kernel, bs=bs)
    out_flat = pl.pallas_call(
        kernel,
        out_shape=jax.ShapeDtypeStruct((N, Cout, Hb * Wb), x.dtype),
        grid=(N, n_h),
        in_specs=[
            pl.BlockSpec((1, C, TH * bs, W), lambda n, h: (n, 0, h, 0)),
            pl.BlockSpec((Cout, Kc), lambda n, h: (0, 0)),
            pl.BlockSpec((W, W), lambda n, h: (0, 0)),
            pl.BlockSpec((Cout, 1), lambda n, h: (0, 0)),
        ],
        out_specs=pl.BlockSpec((1, Cout, TH * Wb), lambda n, h: (n, 0, h)),
        compiler_params=pltpu.CompilerParams(
            dimension_semantics=("parallel", "parallel"),
            vmem_limit_bytes=vmem_limit,
        ),
    )(x, w_scaled, P, bias)

    # Contiguous minor-dim reshape back to NCHW — essentially free in XLA.
    return out_flat.reshape(N, Cout, Hb, Wb)


def _reference_focus_double(x, conv_w, gamma, beta, mean, var, *, block_size,
                            eps=1e-5):
    # Direct jnp transcription of the PyTorch module (inference-mode BN).
    N, C, H, W = x.shape
    bs = block_size
    y = x.reshape(N, C, H // bs, bs, W // bs, bs)
    y = jnp.transpose(y, (0, 3, 5, 1, 2, 4)).reshape(N, C * bs * bs, H // bs, W // bs)
    z = jnp.einsum("km,nmhw->nkhw", conv_w, y)
    scale = gamma / jnp.sqrt(var + eps)
    bias = beta - mean * scale
    z = z * scale[None, :, None, None] + bias[None, :, None, None]
    return z * jnp.clip(z + 3.0, 0.0, 6.0) / 6.0


if __name__ == "__main__":
    key = jax.random.PRNGKey(0)
    N, C, H, W = 2, 4, 16, 16
    block_size = 4          # FocusDouble default
    Cout = 8

    k1, k2, k3, k4, k5, k6 = jax.random.split(key, 6)
    x = jax.random.normal(k1, (N, C, H, W), dtype=jnp.float32)
    conv_w = 0.1 * jax.random.normal(k2, (Cout, C * block_size ** 2), jnp.float32)
    gamma = 1.0 + 0.1 * jax.random.normal(k3, (Cout,), jnp.float32)
    beta = 0.1 * jax.random.normal(k4, (Cout,), jnp.float32)
    mean = 0.1 * jax.random.normal(k5, (Cout,), jnp.float32)
    var = jax.random.uniform(k6, (Cout,), jnp.float32, minval=0.5, maxval=1.5)

    out = focus_double(x, conv_w, gamma, beta, mean, var, block_size=block_size)
    out = jax.block_until_ready(out)

    ref = _reference_focus_double(x, conv_w, gamma, beta, mean, var,
                                  block_size=block_size)
    assert out.shape == (N, Cout, H // block_size, W // block_size)
    assert out.dtype == x.dtype
    # Tolerance accounts for MXU default-precision matmul passes on TPU.
    assert jnp.allclose(out, ref, atol=1e-2, rtol=1e-2), "FocusDouble mismatch vs reference"

    print("KERNEL_OK")
</pallas_src>

<mosaic_0001>
module attributes {stable_mosaic.version = 11 : i64} {
  func.func @_focus_double_kernel(%arg0: i32, %arg1: i32, %arg2: memref<1x4x16x16xf32, #tpu.memory_space<vmem>>, %arg3: memref<8x64xf32, #tpu.memory_space<vmem>>, %arg4: memref<16x16xf32, #tpu.memory_space<vmem>>, %arg5: memref<8x1xf32, #tpu.memory_space<vmem>>, %arg6: memref<1x8x16xf32, #tpu.memory_space<vmem>>) attributes {dimension_semantics = [#tpu.dimension_semantics<parallel>, #tpu.dimension_semantics<parallel>], iteration_bounds = array<i64: 2, 1>, scalar_prefetch = 0 : i64, scratch_operands = 0 : i64, tpu.core_type = #tpu.core_type<tc>, window_params = [{transform_indices = @transform_0, window_bounds = array<i64: 1, 4, 16, 16>}, {pipeline_mode = #tpu.pipeline_mode<synchronous>, transform_indices = @transform_1, window_bounds = array<i64: 8, 64>}, {pipeline_mode = #tpu.pipeline_mode<synchronous>, transform_indices = @transform_2, window_bounds = array<i64: 16, 16>}, {pipeline_mode = #tpu.pipeline_mode<synchronous>, transform_indices = @transform_3, window_bounds = array<i64: 8, 1>}, {transform_indices = @transform_4, window_bounds = array<i64: 1, 8, 16>}]} {
    %c0 = arith.constant 0 : index
    %c0_0 = arith.constant 0 : index
    %c0_1 = arith.constant 0 : index
    %c0_2 = arith.constant 0 : index
    %0 = vector.load %arg2[%c0, %c0_0, %c0_1, %c0_2] : memref<1x4x16x16xf32, #tpu.memory_space<vmem>>, vector<1x4x16x16xf32>
    %1 = vector.shape_cast %0 : vector<1x4x16x16xf32> to vector<64x16xf32>
    %c0_3 = arith.constant 0 : index
    %c0_4 = arith.constant 0 : index
    %2 = vector.load %arg4[%c0_3, %c0_4] : memref<16x16xf32, #tpu.memory_space<vmem>>, vector<16x16xf32>
    %cst = arith.constant dense<0.000000e+00> : vector<64x16xf32>
    %3 = tpu.matmul %1, %2, %cst {dimension_numbers = #tpu.dot_dimension_numbers<[1], [0], [0], [1], [0, 0, 1, 1], [], []>} : vector<64x16xf32>, vector<16x16xf32>, vector<64x16xf32> -> vector<64x16xf32>
    %4 = vector.shape_cast %3 : vector<64x16xf32> to vector<4x4x4x4x4xf32>
    %5 = tpu.transpose %4, [2, 3, 0, 1, 4] : vector<4x4x4x4x4xf32> -> vector<4x4x4x4x4xf32>
    %6 = vector.shape_cast %5 : vector<4x4x4x4x4xf32> to vector<64x16xf32>
    %c0_5 = arith.constant 0 : index
    %c0_6 = arith.constant 0 : index
    %7 = vector.load %arg3[%c0_5, %c0_6] : memref<8x64xf32, #tpu.memory_space<vmem>>, vector<8x64xf32>
    %cst_7 = arith.constant dense<0.000000e+00> : vector<8x16xf32>
    %8 = tpu.matmul %7, %6, %cst_7 {dimension_numbers = #tpu.dot_dimension_numbers<[1], [0], [0], [1], [0, 0, 1, 1], [], []>} : vector<8x64xf32>, vector<64x16xf32>, vector<8x16xf32> -> vector<8x16xf32>
    %c0_8 = arith.constant 0 : index
    %c0_9 = arith.constant 0 : index
    %9 = vector.load %arg5[%c0_8, %c0_9] : memref<8x1xf32, #tpu.memory_space<vmem>>, vector<8x1xf32>
    %10 = vector.broadcast %9 : vector<8x1xf32> to vector<8x16xf32>
    %11 = arith.addf %8, %10 : vector<8x16xf32>
    %cst_10 = arith.constant 3.000000e+00 : f32
    %12 = vector.broadcast %cst_10 : f32 to vector<8x16xf32>
    %13 = arith.addf %11, %12 : vector<8x16xf32>
    %cst_11 = arith.constant 0.000000e+00 : f32
    %cst_12 = arith.constant 6.000000e+00 : f32
    %14 = vector.broadcast %cst_11 : f32 to vector<8x16xf32>
    %15 = arith.maximumf %14, %13 : vector<8x16xf32>
    %16 = vector.broadcast %cst_12 : f32 to vector<8x16xf32>
    %17 = arith.minimumf %16, %15 : vector<8x16xf32>
    %18 = arith.mulf %11, %17 : vector<8x16xf32>
    %cst_13 = arith.constant 0.166666672 : f32
    %19 = vector.broadcast %cst_13 : f32 to vector<8x16xf32>
    %20 = arith.mulf %18, %19 : vector<8x16xf32>
    %21 = vector.shape_cast %20 : vector<8x16xf32> to vector<1x8x16xf32>
    %c0_14 = arith.constant 0 : index
    %c0_15 = arith.constant 0 : index
    %c0_16 = arith.constant 0 : index
    %22 = vector.load %arg6[%c0_14, %c0_15, %c0_16] : memref<1x8x16xf32, #tpu.memory_space<vmem>>, vector<1x8x16xf32>
    tpu.vector_store %arg6[%c0_14, %c0_15, %c0_16], %21 {strides = array<i32>} : memref<1x8x16xf32, #tpu.memory_space<vmem>>, vector<1x8x16xf32>,
    return
  }
  func.func @transform_0(%arg0: i32, %arg1: i32) -> (i32, i32, i32, i32) {
    %c0_i32 = arith.constant 0 : i32
    %c0_i32_0 = arith.constant 0 : i32
    %c0_i32_1 = arith.constant 0 : i32
    return %arg0, %c0_i32, %arg1, %c0_i32_0 : i32, i32, i32, i32
  }
  func.func @transform_1(%arg0: i32, %arg1: i32) -> (i32, i32) {
    %c0_i32 = arith.constant 0 : i32
    %c0_i32_0 = arith.constant 0 : i32
    %c0_i32_1 = arith.constant 0 : i32
    return %c0_i32, %c0_i32_0 : i32, i32
  }
  func.func @transform_2(%arg0: i32, %arg1: i32) -> (i32, i32) {
    %c0_i32 = arith.constant 0 : i32
    %c0_i32_0 = arith.constant 0 : i32
    %c0_i32_1 = arith.constant 0 : i32
    return %c0_i32, %c0_i32_0 : i32, i32
  }
  func.func @transform_3(%arg0: i32, %arg1: i32) -> (i32, i32) {
    %c0_i32 = arith.constant 0 : i32
    %c0_i32_0 = arith.constant 0 : i32
    %c0_i32_1 = arith.constant 0 : i32
    return %c0_i32, %c0_i32_0 : i32, i32
  }
  func.func @transform_4(%arg0: i32, %arg1: i32) -> (i32, i32, i32) {
    %c0_i32 = arith.constant 0 : i32
    %c0_i32_0 = arith.constant 0 : i32
    return %arg0, %c0_i32, %arg1 : i32, i32, i32
  }
}

</mosaic_0001>

<bundles_post_ra>
// kernel: tpu_custom_call.1
= control target key start
LH: loop header
LB: loop body
LE: loop exit
PB: predicated region body
PF: predicated region fallthrough
CT: control target
= control target key end

     0   :  { %s3581_s0 = inlined_call_operand.hbm [shape: f32[2,4,16,16], index: 0, kind: input, shape index: {}]   ;;  %s3582_s1 = inlined_call_operand.vmem [shape: f32[8,64], index: 1, kind: input, shape index: {}]   ;;  %s3583_s2 = inlined_call_operand.hbm [shape: f32[16,16], index: 2, kind: input, shape index: {}]   ;;  %s3584_s3 = inlined_call_operand.vmem [shape: f32[8,1], index: 3, kind: input, shape index: {}]   ;;  %s3585_s4 = inlined_call_operand.hbm [shape: f32[2,8,16], index: 4, kind: output, shape index: {}]  }
   0x1   :  { %3589 = sst [smem:[#allocation11_spill]] %s3583_s2 }
   0x2   :  { %9 = vsyncpa [#allocation3], 0 }
   0x3   :  { %11 = vsyncpa [#allocation3 + $0x1], 0 }
   0x4   :  { %12 = vsyncpa [#allocation6], 0 }
   0x5   :  { %13 = vsyncpa [#allocation4], 0 }
   0x6   :  { %15 = vsyncpa [#allocation4 + $0x1], 0  ;;  %s2799_s15 = smov 0   ;;  %s2801_s16 = smov 0  }
   0x7   :  { %s2803_s17 = smov 0   ;;  %s2805_s18 = smov 0  }
   0x8   :  { %s2807_s19 = smov 0   ;;  %s2809_s20 = smov 0  }
   0x9 LB: > { %s2419_s21 = sadd.s32 4294967295, %s2756_s20   ;;  %s2420_s22 = sadd.s32 4294967294, %s2756_s20   ;;  %s2756_s20 = sphi %s2809_s20, %s21_s20   ;;  %s2752_s19 = sphi %s2807_s19, %s3609_s19   ;;  %s2748_s18 = sphi %s2805_s18, %s3608_s18   ;;  %s2744_s17 = sphi %s2803_s17, %s3607_s17   ;;  %s2740_s16 = sphi %s2801_s16, %s3606_s16   ;;  %s2736_s15 = sphi %s2799_s15, %s3605_s15  }
   0xa   : > { %p55_p0 = scmp.ne.s32.totalorder %s2740_s16, %s2736_s15  ;;  %p2833_p1 = scmp.eq.s32.totalorder %s2419_s21, 0 }
   0xb   : > { %p2837_p2 = scmp.eq.s32.totalorder %s2419_s21, 1  ;;  %p150_p3 = scmp.eq.s32.totalorder %s2420_s22, 1 }
   0xc   : > { %p2843_p4 = por %p2833_p1, %p55_p0  ;;  %p2421_p5 = scmp.ge.s32.totalorder %s2756_s20, 1 }
   0xd   : > { %p2848_p6 = por %p150_p3, %p55_p0  ;;  %p157_p7 = scmp.lt.s32.totalorder %s2756_s20, 3 }
   0xe   : > { %s3592_s25 = scalar_select %p2843_p4, 1, 0 }
   0xf   : > { %s3593_s26 = scalar_select %p2848_p6, 1, 0 }
  0x10   : > { %p2853_p8 = pnand %p2421_p5, %p157_p7  ;;  %s2758_s28 = smov [#allocation5]  }
  0x11   : > { %s172_s29 = sshll.u32 %s2758_s28, 4  ;;  %s33_s5 = sadd.s32 1, %s2752_s19  ;;  %s173_s29 = int_to_ptr.vmem [resolvable:$true] %s172_s29 }
  0x12   : > { %p2539_p9 = pneg %p2853_p8  ;;  %s2629_s6 = scalar_lea.vmem %s173_s29, 256 }
  0x13   : > { %p2630_p13 = scmp.ne.s32.totalorder %s173_s29, %s2629_s6  ;;  %p2637_p5 = scmp.lt.s32.totalorder %s173_s29, %s173_s29 }
  0x14   : > { %p2862_p11 = pnand %p2539_p9, %p2833_p1  ;;  %p2638_p7 = scmp.lt.s32.totalorder %s2629_s6, %s2629_s6 }
  0x16   : > { %p2620_p12 = pneg %p2862_p11  ;;  %p2639_p6 = por %p2638_p7, %p2637_p5 }
  0x18   : > { %p2632_p0 = pnand %p2630_p13, %p2620_p12 }
  0x1a   : > { %p2633_p3 = pneg %p2632_p0 }
  0x1c   : > { %p2640_p4 = pnand %p2639_p6, %p2633_p3 }
  0x1e   : > { %2643 = shalt.err (!%p2640_p4)
}
  0x1f   : > { %s3587_s7 = smov 128   ;;  %s3588_s8 = smov 8  }
  0x20   : > { %s3596_s2 = sld [smem:[#allocation11_spill]]  ;;  %p35_p4 = scmp.ge.s32.totalorder %s33_s5, 2 }
  0x21   : > { %s42_s11 = sadd.s32 1, %s2744_s17  ;;  %p49_p6 = scmp.ne.s32.totalorder %s2744_s17, %s2740_s16 }
  0x22   : > { %p50_p9 = scmp.eq.s32.totalorder %s2756_s20, 0  ;;  %s3611_s5 = smov (%p35_p4, %s33_s5), 0 }
  0x23   : > { %p2889_p13 = por %p2837_p2, %p49_p6  ;;  %s37_s14 = ssub.s32 %s2752_s19, %s3611_s5 }
  0x24   : > { %p2883_p12 = por %p50_p9, %p49_p6  ;;  %p2552_p0 = scmp.lt.s32.totalorder %s2756_s20, 2 }
  0x25   : > { %s189_s21 = sand.u32 1, %s2744_s17  }
  0x26   : > { %2542 = dma.hbm_to_vmem [thread:$0]  (!%p2862_p11), %s3596_s2, 256, %s173_s29, [#allocation6], %s3587_s7, %s3587_s7, %s3588_s8  }
  0x27   : > { %p40_p11 = scmp.eq.s32.totalorder %s37_s14, 0  ;;  %s2424_s22 = sshll.u32 %s189_s21, 6 }
  0x28   : > { %s2476_s29 = sshll.u32 %s2752_s19, 10  ;;  %s193_s10 = scalar_lea.vmem [#allocation2], %s2424_s22 }
  0x29   : > { %s2898_s28 = scalar_select %p40_p11, %s2744_s17, %s42_s11  }
  0x2a   : > { %s201_s9 = scalar_lea.hbm %s3581_s0, %s2476_s29  ;;  %s202_s7 = sshll.u32 %s193_s10, 4  ;;  %s203_s7 = int_to_ptr.vmem [resolvable:$true] %s202_s7 }
  0x2b   : > { %p2906_p2 = pnand %p2552_p0, %p2883_p12  ;;  %s190_s8 = scalar_lea.sflag [#allocation3], %s189_s21 }
  0x2c   : > { %s2657_s14 = scalar_lea.vmem %s203_s7, 1024  ;;  %s2761_s11 = smov [#allocation2]  }
  0x2d   : > { %p2646_p3 = pneg %p2906_p2  ;;  %p2658_p5 = scmp.ne.s32.totalorder %s203_s7, %s2657_s14 }
  0x2e   : > { %s2662_s2 = sshll.u32 %s2761_s11, 4  ;;  %s2663_s2 = int_to_ptr.vmem [resolvable:$false] %s2662_s2 }
  0x2f   : > { %p2660_p7 = pnand %p2658_p5, %p2646_p3  ;;  %s2664_s29 = scalar_lea.vmem %s2663_s2, 2048 }
  0x30   : > { %p2665_p6 = scmp.lt.s32.totalorder %s203_s7, %s2663_s2  ;;  %p2666_p9 = scmp.lt.s32.totalorder %s2664_s29, %s2657_s14 }
  0x31   : > { %p2661_p4 = pneg %p2660_p7 }
  0x32   : > { %p2667_p11 = por %p2666_p9, %p2665_p6 }
  0x34   : > { %p2668_p10 = pnand %p2667_p11, %p2661_p4 }
  0x36   : > { %2671 = shalt.err (!%p2668_p10)
}
  0x37   : > { %s3600_s12 = smov 8   ;;  %s3601_s22 = smov 128  }
  0x38   : > { %2546 = dma.hbm_to_vmem [thread:$0]  (!%p2906_p2), %s201_s9, 1024, %s203_s7, %s190_s8, %s3601_s22, %s3601_s22, %s3600_s12  }
  0x39   : > { %214 = sbr.rel (%p2853_p8) target bundleno = 839 (0x347), region = 36  ;;  %s2920_s21 = sand.u32 (!%p2853_p8), 1, %s2740_s16  }
  0x3a   : > { %s2428_s2 = sshll.u32 (!%p2853_p8), %s2920_s21, 6  ;;  %s217_s30 = scalar_lea.sflag (!%p2853_p8), [#allocation3], %s2920_s21 }
  0x3b   : > { %s220_s6 = scalar_lea.vmem (!%p2853_p8), [#allocation2], %s2428_s2  ;;  %p3602_p12 = scmp.ne.s32.totalorder (!%p2853_p8), %s3592_s25, 0 }
  0x3e   : > { %2723 = dma.done.wait (%p3602_p12), %s217_s30, 1024  }
  0x3f   : > { %2725 = vsyncadd (%p3602_p12), %s217_s30, 4294966272 }
  0x40   : > { %2727 = dma.done.wait (%p2833_p1), [#allocation6], 256  }
  0x41   : > { %2729 = vsyncadd (%p2833_p1), [#allocation6], 4294967040  ;;  %vm260_vm0 = vcmask 130048   ;;  %v259_v0 = vld [vmem:[#allocation5 + $0x8] sm:$0xff]  ;;  %v258_v1 = vld [vmem:[#allocation5] sm:$0xff]  ;;  %s2762_s23 = smov 120   ;;  %v475_v20 = vlaneseq }
  0x42   : > { %v250_v2 = vld [vmem:[%s220_s6] sm:$0xff]  ;;  %2496 = vmatprep.subr.mxu0 %v259_v0  ;;  %v251_v3 = vld [vmem:[%s220_s6 + $0x8] sm:$0xff]  ;;  %v252_v4 = vld [vmem:[%s220_s6 + $0x10] sm:$0xff]  ;;  %s2763_s25 = smov 124   ;;  %s2764_s27 = smov 116   ;;  %vm2771_vm1 = vmmov 0  }
  0x43   : > { %2500 = vmatprep.mubr.msk.f32.mxu0 %vm260_vm0, %v250_v2  ;;  %2497 = vmatpush3.msra.mxu0 %v259_v0  ;;  %v253_v5 = vld [vmem:[%s220_s6 + $0x18] sm:$0xff]  ;;  %v254_v6 = vld [vmem:[%s220_s6 + $0x20] sm:$0xff]  ;;  %v255_v7 = vld [vmem:[%s220_s6 + $0x28] sm:$0xff]  ;;  %v2765_v18 = vmov 1983009808   ;;  %v476_v24 = vshrl.u32 %v475_v20, 7 }
  0x44   : > { %2498 = vmatprep.subr.mxu0 %v258_v1  ;;  %v256_v8 = vld [vmem:[%s220_s6 + $0x30] sm:$0xff]  ;;  %v257_v9 = vld [vmem:[%s220_s6 + $0x38] sm:$0xff]  ;;  %v473_v19 = vunpack.c.l.s4 %v2765_v18  ;;  %v2766_v25 = vmov 1934713408   ;;  %s2767_s7 = smov 8   ;;  %s2768_s8 = smov 4  }
  0x45   : > { %2499 = vmatpush3.msra.mxu0 %v258_v1  ;;  %v505_v26 = vunpack.c.l.s4 %v2766_v25  ;;  %s2769_s9 = smov 12   ;;  %vm2198_vm2 = vcmask 31744   ;;  %vm2207_vm3 = vcmask 64512   ;;  %vm2216_vm4 = vcmask 97280   ;;  %s2430_s29 = sshll.u32 %s2920_s21, 3 }
  0x46   : > { %2501 = vmatmul.mubr.msk.f32.vlgmr.msra.gmra.mxu0 %vm260_vm0, %v251_v3  ;;  %v474_v23 = vunpack.c.0.s8 %v473_v19  ;;  %vm2232_vm5 = vcmask 523264   ;;  %s2473_s12 = sshll.u32 %s2748_s18, 7  ;;  %s248_s22 = scalar_lea.vmem [#allocation7], %s2430_s29 }
  0x47   : > { %2503 = vmatprep.mubr.msk.f32.mxu0 %vm260_vm0, %v252_v4  ;;  %v506_v34 = vunpack.c.0.s8 %v505_v26  ;;  %s2327_s2 = sshll.u32 %s248_s22, 4  ;;  %s2328_s2 = int_to_ptr.vmem [resolvable:$true] %s2327_s2 }
  0x48   : > { %v2983_v30 = vsub.s32 %v474_v23, %v476_v24 }
  0x49   : > { %v2991_v43 = vsub.s32 %v506_v34, %v476_v24 }
  0x4a   : > { %2504 = vmatmul.mubr.msk.f32.gmra.mxu0 %vm260_vm0, %v253_v5 }
  0x4b   : > { %2506 = vmatprep.mubr.msk.f32.mxu0 %vm260_vm0, %v254_v6 }
  0x4e   : > { %2507 = vmatmul.mubr.msk.f32.gmra.mxu0 %vm260_vm0, %v255_v7 }
  0x4f   : > { %2509 = vmatprep.mubr.msk.f32.mxu0 %vm260_vm0, %v256_v8 }
  0x52   : > { %2510 = vmatmul.mubr.msk.f32.gmra.mxu0 %vm260_vm0, %v257_v9 }
 0x106   : > { %v2502_v10 = vpop.f32.mrf.mxu0 }
 0x107   : > { %424 = vrot.lane.b32.xlu1 %v2502_v10, %s2762_s23  ;;  %400 = vrot.lane.b32.xlu0 %v2502_v10, %s2763_s25 }
 0x108   : > { %v2941_v11 = vpop.f32.mrf.mxu0 }
 0x10a   : > { %v2944_v12 = vpop.f32.mrf.mxu0 }
 0x10b   : > { %448 = vrot.lane.b32.xlu1 %v2502_v10, %s2764_s27  ;;  %398 = vrot.lane.b32.xlu0 %v2941_v11, %s2763_s25 }
 0x10c   : > { %v2952_v13 = vpop.f32.mrf.mxu0 }
 0x10e   : > { %v2957_v14 = vpop.f32.mrf.mxu0 }
 0x10f   : > { %422 = vrot.lane.b32.xlu0 %v2941_v11, %s2762_s23  ;;  %404 = vrot.lane.b32.xlu1 %v2944_v12, %s2763_s25 }
 0x110   : > { %v2961_v15 = vpop.f32.mrf.mxu0 }
 0x112   : > { %v2969_v16 = vpop.f32.mrf.mxu0 }
 0x113   : > { %446 = vrot.lane.b32.xlu0 %v2941_v11, %s2764_s27  ;;  %428 = vrot.lane.b32.xlu1 %v2944_v12, %s2762_s23 }
 0x114   : > { %v2973_v17 = vpop.f32.mrf.mxu0 }
 0x117   : > { %452 = vrot.lane.b32.xlu1 %v2944_v12, %s2764_s27  ;;  %426 = vrot.lane.b32.xlu0 %v2952_v13, %s2762_s23 }
 0x11b   : > { %450 = vrot.lane.b32.xlu0 %v2952_v13, %s2764_s27  ;;  %402 = vrot.lane.b32.xlu1 %v2952_v13, %s2763_s25 }
 0x11f   : > { %408 = vrot.lane.b32.xlu1 %v2957_v14, %s2763_s25  ;;  %406 = vrot.lane.b32.xlu0 %v2961_v15, %s2763_s25 }
 0x123   : > { %432 = vrot.lane.b32.xlu1 %v2957_v14, %s2762_s23  ;;  %430 = vrot.lane.b32.xlu0 %v2961_v15, %s2762_s23 }
 0x127   : > { %456 = vrot.lane.b32.xlu1 %v2957_v14, %s2764_s27  ;;  %454 = vrot.lane.b32.xlu0 %v2961_v15, %s2764_s27 }
 0x12b   : > { %412 = vrot.lane.b32.xlu1 %v2969_v16, %s2763_s25  ;;  %410 = vrot.lane.b32.xlu0 %v2973_v17, %s2763_s25  ;;  %s2313_s25 = scalar_lea.sflag [#allocation4], %s2920_s21 }
 0x12f   : > { %436 = vrot.lane.b32.xlu1 %v2969_v16, %s2762_s23  ;;  %434 = vrot.lane.b32.xlu0 %v2973_v17, %s2762_s23  ;;  %s2325_s23 = scalar_lea.hbm %s3585_s4, %s2473_s12 }
 0x133   : > { %460 = vrot.lane.b32.xlu1 %v2969_v16, %s2764_s27  ;;  %458 = vrot.lane.b32.xlu0 %v2973_v17, %s2764_s27  ;;  %s2672_s27 = scalar_lea.vmem %s2328_s2, 128 }
 0x134   : > { %p2673_p1 = scmp.ne.s32.totalorder %s2328_s2, %s2672_s27 }
 0x136   : > { %p2674_p8 = pnand %p2673_p1, %p2889_p13 }
 0x138   : > { %p2675_p10 = pneg %p2674_p8 }
 0x179   : > { %v425_v21 = vpop.permute.xlu1 %424  ;;  %v401_v22 = vpop.permute.xlu0 %400 }
 0x17a   : > { %v538_v31 = vcombine.low %v2502_v10, %v425_v21  ;;  %v539_v33 = vcombine.high %v2502_v10, %v425_v21 }
 0x17c   : > { %v546_v38 = vrot.slane %v538_v31, %v2983_v30  ;;  %v553_v42 = vrot.slane %v539_v33, %v2983_v30 }
 0x17d   : > { %v449_v27 = vpop.permute.xlu1 %448  ;;  %v399_v28 = vpop.permute.xlu0 %398 }
 0x17e   : > { %v554_v29 = vcombine.low %v401_v22, %v449_v27  ;;  %v555_v32 = vcombine.high %v401_v22, %v449_v27 }
 0x180   : > { %v562_v35 = vrot.slane %v554_v29, %v2983_v30  ;;  %v569_v39 = vrot.slane %v555_v32, %v2983_v30 }
 0x181   : > { %v423_v36 = vpop.permute.xlu0 %422  ;;  %v405_v37 = vpop.permute.xlu1 %404 }
 0x182   : > { %v470_v40 = vcombine.low %v2941_v11, %v423_v36  ;;  %v471_v41 = vcombine.high %v2941_v11, %v423_v36  ;;  %v570_v44 = vcombine.low %v546_v38, %v562_v35  ;;  %v571_v45 = vcombine.high %v546_v38, %v562_v35 }
 0x183   : > { %v586_v50 = vcombine.low %v553_v42, %v569_v39  ;;  %v587_v51 = vcombine.high %v553_v42, %v569_v39 }
 0x184   : > { %v478_v52 = vrot.slane %v470_v40, %v2983_v30  ;;  %v485_v53 = vrot.slane %v471_v41, %v2983_v30  ;;  %v578_v56 = vrot.slane %v570_v44, %v2991_v43  ;;  %v585_v57 = vrot.slane %v571_v45, %v2991_v43 }
 0x185   : > { %v447_v46 = vpop.permute.xlu0 %446  ;;  %v429_v47 = vpop.permute.xlu1 %428  ;;  %v594_v2 = vrot.slane %v586_v50, %v2991_v43  ;;  %v601_v3 = vrot.slane %v587_v51, %v2991_v43 }
 0x186   : > { %v486_v48 = vcombine.low %v399_v28, %v447_v46  ;;  %v487_v49 = vcombine.high %v399_v28, %v447_v46  ;;  %v674_v58 = vcombine.low %v2944_v12, %v429_v47  ;;  %v675_v59 = vcombine.high %v2944_v12, %v429_v47 }
 0x188   : > { %v494_v54 = vrot.slane %v486_v48, %v2983_v30  ;;  %v501_v55 = vrot.slane %v487_v49, %v2983_v30  ;;  %v682_v10 = vrot.slane %v674_v58, %v2983_v30  ;;  %v689_v11 = vrot.slane %v675_v59, %v2983_v30 }
 0x189   : > { %v453_v60 = vpop.permute.xlu1 %452  ;;  %v427_v61 = vpop.permute.xlu0 %426 }
 0x18a   : > { %v502_v62 = vcombine.low %v478_v52, %v494_v54  ;;  %v503_v63 = vcombine.high %v478_v52, %v494_v54  ;;  %v518_v0 = vcombine.low %v485_v53, %v501_v55  ;;  %v519_v1 = vcombine.high %v485_v53, %v501_v55 }
 0x18b   : > { %v690_v4 = vcombine.low %v405_v37, %v453_v60  ;;  %v691_v5 = vcombine.high %v405_v37, %v453_v60  ;;  %v606_v12 = vcombine.low %v2952_v13, %v427_v61  ;;  %v607_v18 = vcombine.high %v2952_v13, %v427_v61 }
 0x18c   : > { %v510_v6 = vrot.slane %v502_v62, %v2991_v43  ;;  %v517_v7 = vrot.slane %v503_v63, %v2991_v43  ;;  %v526_v8 = vrot.slane %v518_v0, %v2991_v43  ;;  %v533_v9 = vrot.slane %v519_v1, %v2991_v43 }
 0x18d   : > { %v451_v19 = vpop.permute.xlu0 %450  ;;  %v403_v20 = vpop.permute.xlu1 %402  ;;  %v698_v32 = vrot.slane %v690_v4, %v2983_v30  ;;  %v705_v13 = vrot.slane %v691_v5, %v2983_v30  ;;  %v614_v41 = vrot.slane %v606_v12, %v2983_v30  ;;  %v621_v42 = vrot.slane %v607_v18, %v2983_v30 }
 0x18e   : > { %v1014_v21 = vcombine.low %v510_v6, %v578_v56  ;;  %v1022_v22 = vcombine.low %v526_v8, %v594_v2  ;;  %v2439_v23 = vcombine.high %v510_v6, %v578_v56  ;;  %v2440_v24 = vcombine.high %v526_v8, %v594_v2 }
 0x18f   : > { %v1082_v25 = vcombine.low %v517_v7, %v585_v57  ;;  %v1090_v26 = vcombine.low %v533_v9, %v601_v3  ;;  %v2441_v27 = vcombine.high %v517_v7, %v585_v57  ;;  %v2442_v28 = vcombine.high %v533_v9, %v601_v3 }
 0x190   : > { %v3012_v29 = vrot.slane %v1014_v21, %v2983_v30  ;;  %v3015_v31 = vrot.slane %v1022_v22, %v2983_v30  ;;  %v3020_v33 = vrot.slane %v2439_v23, %v2983_v30  ;;  %v3023_v34 = vrot.slane %v2440_v24, %v2983_v30 }
 0x191   : > { %v1123_v35 = vrot.slane %v2441_v27, %v2983_v30  ;;  %v1131_v36 = vrot.slane %v2442_v28, %v2983_v30  ;;  %v3027_v37 = vpop.permute.xlu1 %408  ;;  %v3029_v38 = vpop.permute.xlu0 %406  ;;  %v1089_v39 = vrot.slane %v1082_v25, %v2983_v30  ;;  %v1097_v40 = vrot.slane %v1090_v26, %v2983_v30 }
 0x192   : > { %v1030_v44 = vcombine.low %v3012_v29, %v3015_v31  ;;  %v1031_v45 = vcombine.high %v3012_v29, %v3015_v31  ;;  %v706_v48 = vcombine.low %v682_v10, %v698_v32  ;;  %v707_v49 = vcombine.high %v682_v10, %v698_v32 }
 0x193   : > { %v1132_v46 = vcombine.low %v1123_v35, %v1131_v36  ;;  %v1133_v47 = vcombine.high %v1123_v35, %v1131_v36  ;;  %v722_v50 = vcombine.low %v689_v11, %v705_v13  ;;  %v723_v51 = vcombine.high %v689_v11, %v705_v13 }
 0x194   : > { %v1064_v52 = vcombine.low %v3020_v33, %v3023_v34  ;;  %v1065_v53 = vcombine.high %v3020_v33, %v3023_v34  ;;  %v622_v54 = vcombine.low %v403_v20, %v451_v19  ;;  %v623_v55 = vcombine.high %v403_v20, %v451_v19 }
 0x195   : > { %v433_v56 = vpop.permute.xlu1 %432  ;;  %v431_v57 = vpop.permute.xlu0 %430  ;;  %v1098_v58 = vcombine.low %v1089_v39, %v1097_v40  ;;  %v1099_v59 = vcombine.high %v1089_v39, %v1097_v40  ;;  %v3044_v60 = vrot.slane %v1133_v47, %v2991_v43  ;;  %v3047_v61 = vrot.slane %v1132_v46, %v2991_v43 }
 0x196   : > { %v714_v62 = vrot.slane %v706_v48, %v2991_v43  ;;  %v721_v63 = vrot.slane %v707_v49, %v2991_v43  ;;  %v630_v0 = vrot.slane %v622_v54, %v2983_v30  ;;  %v637_v1 = vrot.slane %v623_v55, %v2983_v30 }
 0x197   : > { %v730_v2 = vrot.slane %v722_v50, %v2991_v43  ;;  %v737_v3 = vrot.slane %v723_v51, %v2991_v43  ;;  %v810_v4 = vcombine.low %v2957_v14, %v433_v56  ;;  %v811_v5 = vcombine.high %v2957_v14, %v433_v56 }
 0x198   : > { %v638_v6 = vcombine.low %v614_v41, %v630_v0  ;;  %v639_v7 = vcombine.high %v614_v41, %v630_v0  ;;  %v654_v8 = vcombine.low %v621_v42, %v637_v1  ;;  %v655_v9 = vcombine.high %v621_v42, %v637_v1 }
 0x199   : > { %v457_v10 = vpop.permute.xlu1 %456  ;;  %v455_v11 = vpop.permute.xlu0 %454  ;;  %v742_v12 = vcombine.low %v2961_v15, %v431_v57  ;;  %v743_v18 = vcombine.high %v2961_v15, %v431_v57  ;;  %v3060_v19 = vrot.slane %v1099_v59, %v2991_v43  ;;  %v3063_v20 = vrot.slane %v1098_v58, %v2991_v43 }
 0x19a   : > { %v646_v21 = vrot.slane %v638_v6, %v2991_v43  ;;  %v653_v14 = vrot.slane %v639_v7, %v2991_v43  ;;  %v662_v22 = vrot.slane %v654_v8, %v2991_v43  ;;  %v669_v23 = vrot.slane %v655_v9, %v2991_v43 }
 0x19b   : > { %v826_v24 = vcombine.low %v3027_v37, %v457_v10  ;;  %v827_v25 = vcombine.high %v3027_v37, %v457_v10  ;;  %v758_v15 = vcombine.low %v3029_v38, %v455_v11  ;;  %v759_v26 = vcombine.high %v3029_v38, %v455_v11 }
 0x19c   : > { %v1150_v27 = vcombine.low %v646_v21, %v714_v62  ;;  %v1158_v28 = vcombine.low %v662_v22, %v730_v2  ;;  %v2443_v32 = vcombine.high %v646_v21, %v714_v62  ;;  %v2444_v13 = vcombine.high %v662_v22, %v730_v2 }
 0x19d   : > { %v1218_v35 = vcombine.low %v653_v14, %v721_v63  ;;  %v1226_v36 = vcombine.low %v669_v23, %v737_v3  ;;  %v2445_v39 = vcombine.high %v653_v14, %v721_v63  ;;  %v2446_v40 = vcombine.high %v669_v23, %v737_v3  ;;  %v3097_v50 = vpop.permute.xlu1 %412  ;;  %v3099_v51 = vpop.permute.xlu0 %410 }
 0x19e   : > { %v3074_v41 = vrot.slane %v1150_v27, %v2983_v30  ;;  %v3077_v42 = vrot.slane %v1158_v28, %v2983_v30  ;;  %v3080_v37 = vrot.slane %v2443_v32, %v2983_v30  ;;  %v3083_v46 = vrot.slane %v2444_v13, %v2983_v30 }
 0x19f   : > { %v3086_v38 = vrot.slane %v1218_v35, %v2983_v30  ;;  %v3089_v47 = vrot.slane %v1226_v36, %v2983_v30  ;;  %v3092_v48 = vrot.slane %v2445_v39, %v2983_v30  ;;  %v3095_v49 = vrot.slane %v2446_v40, %v2983_v30 }
 0x1a0   : > { %v818_v54 = vrot.slane %v810_v4, %v2983_v30  ;;  %v825_v55 = vrot.slane %v811_v5, %v2983_v30  ;;  %v750_v56 = vrot.slane %v742_v12, %v2983_v30  ;;  %v757_v57 = vrot.slane %v743_v18, %v2983_v30 }
 0x1a1   : > { %v1166_v58 = vcombine.low %v3074_v41, %v3077_v42  ;;  %v1167_v59 = vcombine.high %v3074_v41, %v3077_v42  ;;  %v1200_v62 = vcombine.low %v3080_v37, %v3083_v46  ;;  %v1201_v63 = vcombine.high %v3080_v37, %v3083_v46  ;;  %v437_v22 = vpop.permute.xlu1 %436  ;;  %v435_v23 = vpop.permute.xlu0 %434 }
 0x1a2   : > { %v834_v0 = vrot.slane %v826_v24, %v2983_v30  ;;  %v841_v1 = vrot.slane %v827_v25, %v2983_v30  ;;  %v766_v2 = vrot.slane %v758_v15, %v2983_v30  ;;  %v773_v3 = vrot.slane %v759_v26, %v2983_v30 }
 0x1a3   : > { %v1234_v4 = vcombine.low %v3086_v38, %v3089_v47  ;;  %v1235_v5 = vcombine.high %v3086_v38, %v3089_v47  ;;  %v1268_v6 = vcombine.low %v3092_v48, %v3095_v49  ;;  %v1269_v7 = vcombine.high %v3092_v48, %v3095_v49 }
 0x1a4   : > { %v842_v8 = vcombine.low %v818_v54, %v834_v0  ;;  %v843_v9 = vcombine.high %v818_v54, %v834_v0  ;;  %v858_v10 = vcombine.low %v825_v55, %v841_v1  ;;  %v859_v11 = vcombine.high %v825_v55, %v841_v1 }
 0x1a5   : > { %v774_v12 = vcombine.low %v750_v56, %v766_v2  ;;  %v775_v18 = vcombine.high %v750_v56, %v766_v2  ;;  %v790_v21 = vcombine.low %v757_v57, %v773_v3  ;;  %v791_v14 = vcombine.high %v757_v57, %v773_v3 }
 0x1a6   : > { %v850_v24 = vrot.slane %v842_v8, %v2991_v43  ;;  %v857_v25 = vrot.slane %v843_v9, %v2991_v43  ;;  %v866_v15 = vrot.slane %v858_v10, %v2991_v43  ;;  %v873_v26 = vrot.slane %v859_v11, %v2991_v43 }
 0x1a7   : > { %v782_v27 = vrot.slane %v774_v12, %v2991_v43  ;;  %v789_v28 = vrot.slane %v775_v18, %v2991_v43  ;;  %v798_v32 = vrot.slane %v790_v21, %v2991_v43  ;;  %v805_v13 = vrot.slane %v791_v14, %v2991_v43  ;;  %v461_v21 = vpop.permute.xlu1 %460  ;;  %v459_v14 = vpop.permute.xlu0 %458 }
 0x1a8   : > { %v946_v35 = vcombine.low %v2969_v16, %v437_v22  ;;  %v947_v36 = vcombine.high %v2969_v16, %v437_v22  ;;  %v878_v39 = vcombine.low %v2973_v17, %v435_v23  ;;  %v879_v40 = vcombine.high %v2973_v17, %v435_v23 }
 0x1a9   : > { %v1286_v54 = vcombine.low %v782_v27, %v850_v24  ;;  %v1294_v55 = vcombine.low %v798_v32, %v866_v15  ;;  %v2447_v56 = vcombine.high %v782_v27, %v850_v24  ;;  %v2448_v57 = vcombine.high %v798_v32, %v866_v15 }
 0x1aa   : > { %v1354_v0 = vcombine.low %v789_v28, %v857_v25  ;;  %v1362_v1 = vcombine.low %v805_v13, %v873_v26  ;;  %v2449_v2 = vcombine.high %v789_v28, %v857_v25  ;;  %v2450_v3 = vcombine.high %v805_v13, %v873_v26 }
 0x1ab   : > { %v3138_v8 = vrot.slane %v1286_v54, %v2983_v30  ;;  %v3141_v9 = vrot.slane %v1294_v55, %v2983_v30  ;;  %v3144_v16 = vrot.slane %v2447_v56, %v2983_v30  ;;  %v3147_v10 = vrot.slane %v2448_v57, %v2983_v30 }
 0x1ac   : > { %v3150_v17 = vrot.slane %v1354_v0, %v2983_v30  ;;  %v3153_v11 = vrot.slane %v1362_v1, %v2983_v30  ;;  %v1395_v12 = vrot.slane %v2449_v2, %v2983_v30  ;;  %v1403_v18 = vrot.slane %v2450_v3, %v2983_v30 }
 0x1ad   : > { %v954_v22 = vrot.slane %v946_v35, %v2983_v30  ;;  %v961_v23 = vrot.slane %v947_v36, %v2983_v30  ;;  %v886_v24 = vrot.slane %v878_v39, %v2983_v30  ;;  %v893_v25 = vrot.slane %v879_v40, %v2983_v30 }
 0x1ae   : > { %v1302_v15 = vcombine.low %v3138_v8, %v3141_v9  ;;  %v1303_v26 = vcombine.high %v3138_v8, %v3141_v9  ;;  %v1404_v27 = vcombine.low %v1395_v12, %v1403_v18  ;;  %v1405_v28 = vcombine.high %v1395_v12, %v1403_v18 }
 0x1af   : > { %v962_v32 = vcombine.low %v3097_v50, %v461_v21  ;;  %v963_v13 = vcombine.high %v3097_v50, %v461_v21  ;;  %v894_v35 = vcombine.low %v3099_v51, %v459_v14  ;;  %v895_v36 = vcombine.high %v3099_v51, %v459_v14 }
 0x1b0   : > { %v1336_v39 = vcombine.low %v3144_v16, %v3147_v10  ;;  %v1337_v40 = vcombine.high %v3144_v16, %v3147_v10  ;;  %v1370_v54 = vcombine.low %v3150_v17, %v3153_v11  ;;  %v1371_v55 = vcombine.high %v3150_v17, %v3153_v11 }
 0x1b1   : > { %v970_v56 = vrot.slane %v962_v32, %v2983_v30  ;;  %v977_v50 = vrot.slane %v963_v13, %v2983_v30  ;;  %v902_v57 = vrot.slane %v894_v35, %v2983_v30  ;;  %v909_v51 = vrot.slane %v895_v36, %v2983_v30 }
 0x1b2   : > { %v3182_v0 = vrot.slane %v1269_v7, %v2991_v43  ;;  %v1419_v1 = vrot.slane %v1405_v28, %v2991_v43  ;;  %v3189_v2 = vrot.slane %v1268_v6, %v2991_v43  ;;  %v1412_v3 = vrot.slane %v1404_v27, %v2991_v43 }
 0x1b3   : > { %v978_v17 = vcombine.low %v954_v22, %v970_v56  ;;  %v979_v11 = vcombine.high %v954_v22, %v970_v56  ;;  %v994_v12 = vcombine.low %v961_v23, %v977_v50  ;;  %v995_v18 = vcombine.high %v961_v23, %v977_v50 }
 0x1b4   : > { %v910_v21 = vcombine.low %v886_v24, %v902_v57  ;;  %v911_v14 = vcombine.high %v886_v24, %v902_v57  ;;  %v926_v32 = vcombine.low %v893_v25, %v909_v51  ;;  %v927_v13 = vcombine.high %v893_v25, %v909_v51 }
 0x1b5   : > { %v986_v7 = vrot.slane %v978_v17, %v2991_v43  ;;  %v993_v28 = vrot.slane %v979_v11, %v2991_v43  ;;  %v1002_v35 = vrot.slane %v994_v12, %v2991_v43  ;;  %v1009_v48 = vrot.slane %v995_v18, %v2991_v43 }
 0x1b6   : > { %v918_v49 = vrot.slane %v910_v21, %v2991_v43  ;;  %v925_v6 = vrot.slane %v911_v14, %v2991_v43  ;;  %v934_v22 = vrot.slane %v926_v32, %v2991_v43  ;;  %v941_v23 = vrot.slane %v927_v13, %v2991_v43 }
 0x1b7   : > { %v2034_v24 = vcombine.low %v3044_v60, %v1419_v1  ;;  %v2469_v25 = vcombine.high %v3044_v60, %v1419_v1  ;;  %v1966_v27 = vcombine.low %v3047_v61, %v1412_v3  ;;  %v2467_v36 = vcombine.high %v3047_v61, %v1412_v3 }
 0x1b8   : > { %v1422_v56 = vcombine.low %v918_v49, %v986_v7  ;;  %v1430_v50 = vcombine.low %v934_v22, %v1002_v35  ;;  %v2451_v57 = vcombine.high %v918_v49, %v986_v7  ;;  %v2452_v51 = vcombine.high %v934_v22, %v1002_v35 }
 0x1b9   : > { %v1490_v17 = vcombine.low %v925_v6, %v993_v28  ;;  %v1498_v11 = vcombine.low %v941_v23, %v1009_v48  ;;  %v2453_v12 = vcombine.high %v925_v6, %v993_v28  ;;  %v2454_v18 = vcombine.high %v941_v23, %v1009_v48 }
 0x1ba   : > { %v3205_v21 = vrot.slane %v1422_v56, %v2983_v30  ;;  %v3208_v14 = vrot.slane %v1430_v50, %v2983_v30  ;;  %v3211_v60 = vrot.slane %v2451_v57, %v2983_v30  ;;  %v3214_v1 = vrot.slane %v2452_v51, %v2983_v30 }
 0x1bb   : > { %v1497_v61 = vrot.slane %v1490_v17, %v2983_v30  ;;  %v1505_v3 = vrot.slane %v1498_v11, %v2983_v30  ;;  %v1531_v32 = vrot.slane %v2453_v12, %v2983_v30  ;;  %v1539_v13 = vrot.slane %v2454_v18, %v2983_v30 }
 0x1bc   : > { %v2041_v7 = vrot.slane %v2034_v24, %v2983_v30  ;;  %v2057_v28 = vrot.slane %v2469_v25, %v2983_v30  ;;  %v1973_v35 = vrot.slane %v1966_v27, %v2983_v30  ;;  %v1989_v48 = vrot.slane %v2467_v36, %v2983_v30 }
 0x1bd   : > { %v1439_v49 = vcombine.high %v3205_v21, %v3208_v14  ;;  %v1507_v6 = vcombine.high %v1497_v61, %v1505_v3  ;;  %v1540_v22 = vcombine.low %v1531_v32, %v1539_v13  ;;  %v1541_v23 = vcombine.high %v1531_v32, %v1539_v13 }
 0x1be   : > { %v1472_v56 = vcombine.low %v3211_v60, %v3214_v1  ;;  %v1506_v50 = vcombine.low %v1497_v61, %v1505_v3  ;;  %v1385_v57 = vrot.slane %v1371_v55, %v2991_v43  ;;  %v3230_v24 = vrot.slane %v1370_v54, %v2991_v43 }
 0x1bf   : > { %v1473_v25 = vcombine.high %v3211_v60, %v3214_v1  ;;  %v1555_v27 = vrot.slane %v1541_v23, %v2991_v43  ;;  %v1548_v36 = vrot.slane %v1540_v22, %v2991_v43  ;;  %v1521_v51 = vrot.slane %v1507_v6, %v2991_v43 }
 0x1c0   : > { %v1249_v17 = vrot.slane %v1235_v5, %v2991_v43  ;;  %v1898_v11 = vcombine.low %v3060_v19, %v1385_v57  ;;  %v2465_v55 = vcombine.high %v3060_v19, %v1385_v57  ;;  %v1242_v54 = vrot.slane %v1234_v4, %v2991_v43 }
 0x1c1   : > { %v2042_v12 = vcombine.low %v3182_v0, %v1555_v27  ;;  %v2470_v18 = vcombine.high %v3182_v0, %v1555_v27  ;;  %v1974_v61 = vcombine.low %v3189_v2, %v1548_v36  ;;  %v2468_v3 = vcombine.high %v3189_v2, %v1548_v36 }
 0x1c2   : > { %v1906_v32 = vcombine.low %v1249_v17, %v1521_v51  ;;  %v2466_v13 = vcombine.high %v1249_v17, %v1521_v51  ;;  %v1514_v5 = vrot.slane %v1506_v50, %v2991_v43  ;;  %v1830_v19 = vcombine.low %v3063_v20, %v3230_v24 }
 0x1c3   : > { %v2049_v6 = vrot.slane %v2042_v12, %v2983_v30  ;;  %v2065_v38 = vrot.slane %v2470_v18, %v2983_v30  ;;  %v1981_v47 = vrot.slane %v1974_v61, %v2983_v30  ;;  %v1997_v4 = vrot.slane %v2468_v3, %v2983_v30 }
 0x1c4   : > { %v1905_v0 = vrot.slane %v1898_v11, %v2983_v30  ;;  %v1913_v22 = vrot.slane %v1906_v32, %v2983_v30  ;;  %v1921_v2 = vrot.slane %v2465_v55, %v2983_v30  ;;  %v1929_v23 = vrot.slane %v2466_v13, %v2983_v30 }
 0x1c5   : > { %v2067_v50 = vcombine.high %v2041_v7, %v2049_v6  ;;  %v2083_v57 = vcombine.high %v2057_v28, %v2065_v38  ;;  %v2066_v27 = vcombine.low %v2041_v7, %v2049_v6  ;;  %v2082_v36 = vcombine.low %v2057_v28, %v2065_v38 }
 0x1c6   : > { %v1998_v51 = vcombine.low %v1973_v35, %v1981_v47  ;;  %v2014_v17 = vcombine.low %v1989_v48, %v1997_v4  ;;  %v1999_v12 = vcombine.high %v1973_v35, %v1981_v47  ;;  %v2015_v18 = vcombine.high %v1989_v48, %v1997_v4 }
 0x1c7   : > { %v2081_v61 = vrot.slane %v2067_v50, %v2991_v43  ;;  %v2097_v3 = vrot.slane %v2083_v57, %v2991_v43  ;;  %v3265_v11 = vrot.slane %v2066_v27, %v2991_v43  ;;  %v3268_v32 = vrot.slane %v2082_v36, %v2991_v43 }
 0x1c8   : > { %v3271_v55 = vrot.slane %v1998_v51, %v2991_v43  ;;  %v3274_v7 = vrot.slane %v2014_v17, %v2991_v43  ;;  %v3277_v28 = vrot.slane %v1999_v12, %v2991_v43  ;;  %v1838_v35 = vcombine.low %v1242_v54, %v1514_v5 }
 0x1c9   : > { %v2100_v48 = vcombine.low %v2081_v61, %v2097_v3  ;;  %v2099_v13 = vcombine.high %v3265_v11, %v3268_v32  ;;  %v2029_v6 = vrot.slane %v2015_v18, %v2991_v43  ;;  %v1930_v38 = vcombine.low %v1905_v0, %v1913_v22 }
 0x1ca   : > { %v2101_v47 = vcombine.high %v2081_v61, %v2097_v3  ;;  %v1946_v4 = vcombine.low %v1921_v2, %v1929_v23  ;;  %v1837_v50 = vrot.slane %v1830_v19, %v2983_v30  ;;  %v2463_v57 = vcombine.high %v3063_v20, %v3230_v24 }
 0x1cb   : > { %2156 = vrot.lane.b32.xlu1 %v2100_v48, %s2767_s7  ;;  %2124 = vrot.lane.b32.xlu0 %v2099_v13, %s2768_s8  ;;  %v2031_v27 = vcombine.high %v3271_v55, %v3274_v7  ;;  %v1931_v36 = vcombine.high %v1905_v0, %v1913_v22  ;;  %v1947_v51 = vcombine.high %v1921_v2, %v1929_v23 }
 0x1cc   : > { %v3290_v17 = vrot.slane %v1930_v38, %v2991_v43  ;;  %v3293_v12 = vrot.slane %v1946_v4, %v2991_v43  ;;  %v1845_v19 = vrot.slane %v1838_v35, %v2983_v30  ;;  %v2464_v20 = vcombine.high %v1242_v54, %v1514_v5 }
 0x1cd   : > { %v2032_v24 = vcombine.low %v3277_v28, %v2029_v6  ;;  %v2033_v18 = vcombine.high %v3277_v28, %v2029_v6  ;;  %v1945_v61 = vrot.slane %v1931_v36, %v2991_v43  ;;  %v1961_v3 = vrot.slane %v1947_v51, %v2991_v43 }
 0x1ce   : > { %v1853_v0 = vrot.slane %v2463_v57, %v2983_v30  ;;  %v1861_v22 = vrot.slane %v2464_v20, %v2983_v30  ;;  %v1862_v2 = vcombine.low %v1837_v50, %v1845_v19  ;;  %v1863_v23 = vcombine.high %v1837_v50, %v1845_v19 }
 0x1cf   : > { %2188 = vrot.lane.b32.xlu1 %v2101_v47, %s2769_s9  ;;  %2122 = vrot.lane.b32.xlu0 %v2031_v27, %s2768_s8  ;;  %v1079_v54 = vrot.slane %v1065_v53, %v2991_v43  ;;  %v1215_v5 = vrot.slane %v1201_v63, %v2991_v43  ;;  %v1351_v28 = vrot.slane %v1337_v40, %v2991_v43  ;;  %v2770_v38 = vmov 0.0  }
 0x1d0   : > { %v1963_v35 = vcombine.high %v3290_v17, %v3293_v12  ;;  %v1964_v48 = vcombine.low %v1945_v61, %v1961_v3  ;;  %v1878_v13 = vcombine.low %v1853_v0, %v1861_v22  ;;  %v1879_v6 = vcombine.high %v1853_v0, %v1861_v22  ;;  %2512 = vmatprep.subr.mxu1 %v2770_v38 }
 0x1d1   : > { %v1965_v53 = vcombine.high %v1945_v61, %v1961_v3  ;;  %v1487_v63 = vrot.slane %v1473_v25, %v2991_v43  ;;  %v1762_v47 = vcombine.low %v1079_v54, %v1351_v28  ;;  %v2461_v4 = vcombine.high %v1079_v54, %v1351_v28  ;;  %2528 = vmatprep.mubr.msk.f32.mxu1 %vm2771_vm1, %v2770_v38 }
 0x1d2   : > { %v3324_v50 = vrot.slane %v1862_v2, %v2991_v43  ;;  %v3327_v40 = vrot.slane %v1878_v13, %v2991_v43  ;;  %v3330_v57 = vrot.slane %v1863_v23, %v2991_v43  ;;  %v1344_v27 = vrot.slane %v1336_v39, %v2991_v43 }
 0x1d3   : > { %2154 = vrot.lane.b32.xlu0 %v2032_v24, %s2767_s7  ;;  %2120 = vrot.lane.b32.xlu1 %v1963_v35, %s2768_s8  ;;  %v3339_v25 = vrot.slane %v1879_v6, %v2991_v43  ;;  %v1770_v36 = vcombine.low %v1215_v5, %v1487_v63  ;;  %v1072_v51 = vrot.slane %v1064_v52, %v2991_v43 }
 0x1d4   : > { %v1769_v19 = vrot.slane %v1762_v47, %v2983_v30  ;;  %v1785_v20 = vrot.slane %v2461_v4, %v2983_v30  ;;  %v2462_v61 = vcombine.high %v1215_v5, %v1487_v63  ;;  %v1208_v16 = vrot.slane %v1200_v62, %v2991_v43 }
 0x1d5   : > { %v1777_v10 = vrot.slane %v1770_v36, %v2983_v30  ;;  %v1480_v39 = vrot.slane %v1472_v56, %v2991_v43  ;;  %v1694_v24 = vcombine.low %v1072_v51, %v1344_v27  ;;  %v2459_v33 = vcombine.high %v1072_v51, %v1344_v27 }
 0x1d6   : > { %v1895_v34 = vcombine.high %v3324_v50, %v3327_v40  ;;  %v1793_v52 = vrot.slane %v2462_v61, %v2983_v30  ;;  %v1045_v37 = vrot.slane %v1031_v45, %v2991_v43  ;;  %v1317_v46 = vrot.slane %v1303_v26, %v2991_v43 }
 0x1d7   : > { %2186 = vrot.lane.b32.xlu0 %v2033_v18, %s2769_s9  ;;  %2152 = vrot.lane.b32.xlu1 %v1964_v48, %s2767_s7  ;;  %v1794_v62 = vcombine.low %v1769_v19, %v1777_v10  ;;  %v1795_v60 = vcombine.high %v1769_v19, %v1777_v10  ;;  %v1181_v1 = vrot.slane %v1167_v59, %v2991_v43 }
 0x1d8   : > { %v1810_v56 = vcombine.low %v1785_v20, %v1793_v52  ;;  %v1811_v3 = vcombine.high %v1785_v20, %v1793_v52  ;;  %v1701_v45 = vrot.slane %v1694_v24, %v2983_v30  ;;  %v1702_v0 = vcombine.low %v1208_v16, %v1480_v39 }
 0x1d9   : > { %v3375_v22 = vrot.slane %v1794_v62, %v2991_v43  ;;  %v1717_v26 = vrot.slane %v2459_v33, %v2983_v30  ;;  %v2460_v18 = vcombine.high %v1208_v16, %v1480_v39  ;;  %v1453_v2 = vrot.slane %v1439_v49, %v2991_v43 }
 0x1da   : > { %v3383_v23 = vrot.slane %v1810_v56, %v2991_v43  ;;  %v1809_v59 = vrot.slane %v1795_v60, %v2991_v43  ;;  %v1709_v54 = vrot.slane %v1702_v0, %v2983_v30  ;;  %v1626_v5 = vcombine.low %v1045_v37, %v1317_v46 }
 0x1db   : > { %2184 = vrot.lane.b32.xlu1 %v1965_v53, %s2769_s9  ;;  %2118 = vrot.lane.b32.xlu0 %v1895_v34, %s2768_s8  ;;  %v1825_v28 = vrot.slane %v1811_v3, %v2991_v43  ;;  %v1725_v35 = vrot.slane %v2460_v18, %v2983_v30  ;;  %v1634_v48 = vcombine.low %v1181_v1, %v1453_v2 }
 0x1dc   : > { %v1438_v49 = vcombine.low %v3205_v21, %v3208_v14  ;;  %v1896_v13 = vcombine.low %v3330_v57, %v3339_v25  ;;  %v1726_v6 = vcombine.low %v1701_v45, %v1709_v54  ;;  %v2457_v63 = vcombine.high %v1045_v37, %v1317_v46 }
 0x1dd   : > { %v1827_v47 = vcombine.high %v3375_v22, %v3383_v23  ;;  %v1742_v4 = vcombine.low %v1717_v26, %v1725_v35  ;;  %v1727_v53 = vcombine.high %v1701_v45, %v1709_v54  ;;  %v1743_v27 = vcombine.high %v1717_v26, %v1725_v35 }
 0x1de   : > { %v3398_v36 = vrot.slane %v1726_v6, %v2991_v43  ;;  %v1633_v51 = vrot.slane %v1626_v5, %v2983_v30  ;;  %v1641_v19 = vrot.slane %v1634_v48, %v2983_v30  ;;  %v2458_v20 = vcombine.high %v1181_v1, %v1453_v2 }
 0x1df   : > { %2150 = vrot.lane.b32.xlu0 %v1896_v13, %s2767_s7  ;;  %2116 = vrot.lane.b32.xlu1 %v1827_v47, %s2768_s8  ;;  %v1897_v21 = vcombine.high %v3330_v57, %v3339_v25  ;;  %v1828_v14 = vcombine.low %v1809_v59, %v1825_v28  ;;  %v3407_v61 = vrot.slane %v1742_v4, %v2991_v43  ;;  %v2772_v4 = vmov 0  }
 0x1e0   : > { %v1829_v16 = vcombine.high %v1809_v59, %v1825_v28  ;;  %v1649_v10 = vrot.slane %v2457_v63, %v2983_v30  ;;  %v1657_v39 = vrot.slane %v2458_v20, %v2983_v30  ;;  %v1658_v24 = vcombine.low %v1633_v51, %v1641_v19  ;;  %2617 = vset.pattern.permute.xlu0 %v2772_v4 }
 0x1e1   : > { %v1741_v33 = vrot.slane %v1727_v53, %v2991_v43  ;;  %v1757_v34 = vrot.slane %v1743_v27, %v2991_v43  ;;  %v1659_v52 = vcombine.high %v1633_v51, %v1641_v19  ;;  %v1038_v57 = vrot.slane %v1030_v44, %v2991_v43 }
 0x1e2   : > { %v1759_v25 = vcombine.high %v3398_v36, %v3407_v61  ;;  %v3420_v37 = vrot.slane %v1658_v24, %v2991_v43  ;;  %v1674_v46 = vcombine.low %v1649_v10, %v1657_v39  ;;  %v1174_v62 = vrot.slane %v1166_v58, %v2991_v43 }
 0x1e3   : > { %2182 = vrot.lane.b32.xlu0 %v1897_v21, %s2769_s9  ;;  %2148 = vrot.lane.b32.xlu1 %v1828_v14, %s2767_s7  ;;  %v1310_v29 = vrot.slane %v1302_v15, %v2991_v43  ;;  %v1446_v31 = vrot.slane %v1438_v49, %v2991_v43  ;;  %v2098_v44 = vcombine.low %v3265_v11, %v3268_v32  ;;  %v2226_v14 = vld [vmem:[%s3584_s3] sm:$0xff] }
 0x1e4   : > { %v3436_v60 = vrot.slane %v1674_v46, %v2991_v43  ;;  %v1675_v1 = vcombine.high %v1649_v10, %v1657_v39  ;;  %v2030_v41 = vcombine.low %v3271_v55, %v3274_v7  ;;  %v1962_v42 = vcombine.low %v3290_v17, %v3293_v12 }
 0x1e5   : > { %v1558_v58 = vcombine.low %v1038_v57, %v1310_v29  ;;  %v1566_v56 = vcombine.low %v1174_v62, %v1446_v31  ;;  %v2455_v3 = vcombine.high %v1038_v57, %v1310_v29  ;;  %v2456_v8 = vcombine.high %v1174_v62, %v1446_v31 }
 0x1e6   : > { %v1760_v9 = vcombine.low %v1741_v33, %v1757_v34  ;;  %v1894_v15 = vcombine.low %v3324_v50, %v3327_v40  ;;  %v1826_v26 = vcombine.low %v3375_v22, %v3383_v23  ;;  %v1758_v18 = vcombine.low %v3398_v36, %v3407_v61 }
 0x1e7   : > { %2180 = vrot.lane.b32.xlu1 %v1829_v16, %s2769_s9  ;;  %2114 = vrot.lane.b32.xlu0 %v1759_v25, %s2768_s8  ;;  %v1565_v11 = vrot.slane %v1558_v58, %v2983_v30  ;;  %v1573_v32 = vrot.slane %v1566_v56, %v2983_v30  ;;  %v1581_v45 = vrot.slane %v2455_v3, %v2983_v30 }
 0x1e8   : > { %v1589_v0 = vrot.slane %v2456_v8, %v2983_v30  ;;  %v1690_v2 = vcombine.low %v3420_v37, %v3436_v60  ;;  %v1691_v59 = vcombine.high %v3420_v37, %v3436_v60  ;;  %v1673_v54 = vrot.slane %v1659_v52, %v2991_v43 }
 0x1e9   : > { %v1689_v5 = vrot.slane %v1675_v1, %v2991_v43  ;;  %v1590_v28 = vcombine.low %v1565_v11, %v1573_v32  ;;  %v1761_v48 = vcombine.high %v1741_v33, %v1757_v34  ;;  %v1591_v6 = vcombine.high %v1565_v11, %v1573_v32 }
 0x1ea   : > { %v1606_v35 = vcombine.low %v1581_v45, %v1589_v0  ;;  %v1607_v63 = vcombine.high %v1581_v45, %v1589_v0 }
 0x1eb   : > { %2146 = vrot.lane.b32.xlu0 %v1760_v9, %s2767_s7  ;;  %2112 = vrot.lane.b32.xlu1 %v1691_v59, %s2768_s8  ;;  %v3463_v30 = vrot.slane %v1590_v28, %v2991_v43  ;;  %v1692_v13 = vcombine.low %v1673_v54, %v1689_v5  ;;  %v1693_v53 = vcombine.high %v1673_v54, %v1689_v5 }
 0x1ec   : > { %v3466_v49 = vrot.slane %v1606_v35, %v2991_v43  ;;  %v1605_v51 = vrot.slane %v1591_v6, %v2991_v43  ;;  %v1621_v19 = vrot.slane %v1607_v63, %v2991_v43  ;;  %v2225_v35 = vld [vmem:[%s3582_s1] sm:$0xff] }
 0x1ee   : > { %v1622_v47 = vcombine.low %v3463_v30, %v3466_v49  ;;  %v1623_v27 = vcombine.high %v3463_v30, %v3466_v49  ;;  %v1625_v20 = vcombine.high %v1605_v51, %v1621_v19  ;;  %v1624_v21 = vcombine.low %v1605_v51, %v1621_v19 }
 0x1ef   : > { %2178 = vrot.lane.b32.xlu0 %v1761_v48, %s2769_s9  ;;  %2144 = vrot.lane.b32.xlu1 %v1692_v13, %s2767_s7 }
 0x1f3   : > { %2176 = vrot.lane.b32.xlu1 %v1693_v53, %s2769_s9  ;;  %2110 = vrot.lane.b32.xlu0 %v1623_v27, %s2768_s8 }
 0x1f7   : > { %2174 = vrot.lane.b32.xlu1 %v1625_v20, %s2769_s9  ;;  %2142 = vrot.lane.b32.xlu0 %v1624_v21, %s2767_s7  ;;  %s2773_s7 = smov [#allocation7]  }
 0x1f8   : > { %s2676_s8 = sshll.u32 %s2773_s7, 4  ;;  %s2677_s8 = int_to_ptr.vmem [resolvable:$false] %s2676_s8 }
 0x1f9   : > { %s2678_s18 = scalar_lea.vmem %s2677_s8, 256  ;;  %p2679_p0 = scmp.lt.s32.totalorder %s2328_s2, %s2677_s8 }
 0x1fa   : > { %p2680_p2 = scmp.lt.s32.totalorder %s2678_s18, %s2672_s27 }
 0x1fb   : > { %2229 = vperm.xlu0 %2617, %v2226_v14  }
 0x1fc   : > { %p2681_p3 = por %p2680_p2, %p2679_p0 }
 0x1fe   : > { %p2682_p5 = pnand %p2681_p3, %p2675_p10 }
 0x23d   : > { %v2157_v16 = vpop.permute.xlu1 %2156  ;;  %v2125_v10 = vpop.permute.xlu0 %2124 }
 0x23e   : > { %v2206_v43 = vsel %vm2198_vm2, %v2098_v44, %v2125_v10 }
 0x23f   : > { %v2215_v33 = vsel %vm2207_vm3, %v2206_v43, %v2157_v16 }
 0x241   : > { %v2189_v39 = vpop.permute.xlu1 %2188  ;;  %v2123_v24 = vpop.permute.xlu0 %2122 }
 0x242   : > { %v2224_v34 = vsel %vm2216_vm4, %v2215_v33, %v2189_v39  ;;  %v2205_v25 = vsel %vm2198_vm2, %v2030_v41, %v2123_v24 }
 0x243   : > { %2513 = vmatpush3.msra.mxu1 %v2224_v34 }
 0x244   : > { %2514 = vmatprep.subr.mxu1 %v2770_v38 }
 0x245   : > { %v2155_v52 = vpop.permute.xlu0 %2154  ;;  %v2121_v57 = vpop.permute.xlu1 %2120 }
 0x246   : > { %v2214_v46 = vsel %vm2207_vm3, %v2205_v25, %v2155_v52  ;;  %v2204_v44 = vsel %vm2198_vm2, %v1962_v42, %v2121_v57 }
 0x249   : > { %v2187_v62 = vpop.permute.xlu0 %2186  ;;  %v2153_v29 = vpop.permute.xlu1 %2152 }
 0x24a   : > { %v2223_v31 = vsel %vm2216_vm4, %v2214_v46, %v2187_v62  ;;  %v2213_v1 = vsel %vm2207_vm3, %v2204_v44, %v2153_v29 }
 0x24b   : > { %2515 = vmatpush3.msra.mxu1 %v2223_v31 }
 0x24c   : > { %2516 = vmatprep.subr.mxu1 %v2770_v38 }
 0x24d   : > { %v2185_v58 = vpop.permute.xlu1 %2184  ;;  %v2119_v55 = vpop.permute.xlu0 %2118 }
 0x24e   : > { %v2222_v7 = vsel %vm2216_vm4, %v2213_v1, %v2185_v58  ;;  %v2203_v17 = vsel %vm2198_vm2, %v1894_v15, %v2119_v55 }
 0x24f   : > { %2517 = vmatpush3.msra.mxu1 %v2222_v7 }
 0x250   : > { %2518 = vmatprep.subr.mxu1 %v2770_v38 }
 0x251   : > { %v2151_v41 = vpop.permute.xlu0 %2150  ;;  %v2117_v56 = vpop.permute.xlu1 %2116 }
 0x252   : > { %v2212_v12 = vsel %vm2207_vm3, %v2203_v17, %v2151_v41  ;;  %v2202_v9 = vsel %vm2198_vm2, %v1826_v26, %v2117_v56 }
 0x255   : > { %v2183_v42 = vpop.permute.xlu0 %2182  ;;  %v2149_v3 = vpop.permute.xlu1 %2148 }
 0x256   : > { %v2221_v8 = vsel %vm2216_vm4, %v2212_v12, %v2183_v42  ;;  %v2211_v11 = vsel %vm2207_vm3, %v2202_v9, %v2149_v3 }
 0x257   : > { %2519 = vmatpush3.msra.mxu1 %v2221_v8 }
 0x258   : > { %2520 = vmatprep.subr.mxu1 %v2770_v38 }
 0x259   : > { %v2181_v32 = vpop.permute.xlu1 %2180  ;;  %v2115_v50 = vpop.permute.xlu0 %2114 }
 0x25a   : > { %v2220_v40 = vsel %vm2216_vm4, %v2211_v11, %v2181_v32  ;;  %v2201_v22 = vsel %vm2198_vm2, %v1758_v18, %v2115_v50 }
 0x25b   : > { %2521 = vmatpush3.msra.mxu1 %v2220_v40 }
 0x25c   : > { %2522 = vmatprep.subr.mxu1 %v2770_v38 }
 0x25d   : > { %v2147_v15 = vpop.permute.xlu0 %2146  ;;  %v2113_v45 = vpop.permute.xlu1 %2112 }
 0x25e   : > { %v2210_v23 = vsel %vm2207_vm3, %v2201_v22, %v2147_v15  ;;  %v2200_v54 = vsel %vm2198_vm2, %v1690_v2, %v2113_v45 }
 0x261   : > { %v2179_v0 = vpop.permute.xlu0 %2178  ;;  %v2145_v26 = vpop.permute.xlu1 %2144 }
 0x262   : > { %v2219_v59 = vsel %vm2216_vm4, %v2210_v23, %v2179_v0  ;;  %v2209_v5 = vsel %vm2207_vm3, %v2200_v54, %v2145_v26 }
 0x263   : > { %2523 = vmatpush3.msra.mxu1 %v2219_v59 }
 0x264   : > { %2524 = vmatprep.subr.mxu1 %v2770_v38 }
 0x265   : > { %v2177_v28 = vpop.permute.xlu1 %2176  ;;  %v2111_v36 = vpop.permute.xlu0 %2110 }
 0x266   : > { %v2218_v61 = vsel %vm2216_vm4, %v2209_v5, %v2177_v28  ;;  %v2199_v18 = vsel %vm2198_vm2, %v1622_v47, %v2111_v36 }
 0x267   : > { %2525 = vmatpush3.msra.mxu1 %v2218_v61 }
 0x268   : > { %2526 = vmatprep.subr.mxu1 %v2770_v38 }
 0x269   : > { %v2175_v37 = vpop.permute.xlu1 %2174  ;;  %v2143_v60 = vpop.permute.xlu0 %2142 }
 0x26a   : > { %v2208_v2 = vsel %vm2207_vm3, %v2199_v18, %v2143_v60 }
 0x26b   : > { %v2217_v48 = vsel %vm2216_vm4, %v2208_v2, %v2175_v37 }
 0x26c   : > { %2527 = vmatpush3.msra.mxu1 %v2217_v48 }
 0x26d   : > { %2529 = vmatmul.mubr.msk.f32.vlgmr.msra.gmra.mxu1 %vm2232_vm5, %v2225_v35 }
 0x276   : > { %v2230_v38 = vpop.permute.xlu0 %2229 }
 0x32d   : > { %v2302_v13 = vpop.f32.mrf.mxu1 }
 0x32e   : > { %v2303_v30 = vadd.f32 %v2302_v13, %v2230_v38 }
 0x32f   : > { %v2530_v49 = vpop.f32.mrf.mxu1 }
 0x330   : > { %v2306_v6 = vadd.f32 3.0, %v2303_v30 }
 0x332   : > { %v2307_v63 = vmax.f32 %v2306_v6, 0.0 }
 0x334   : > { %v2308_v47 = vmin.f32 %v2307_v63, 6.0 }
 0x336   : > { %v2309_v4 = vmul.f32 %v2308_v47, %v2303_v30 }
 0x338   : > { %v2310_v53 = vmul.f32 0.16666667, %v2309_v4 }
 0x33a   : > { %2311 = vst.msk [vmem:[%s248_s22] sm:$0xff] %vm260_vm0, %v2310_v53 }
 0x33b   : > { %2685 = shalt.err (!%p2682_p5)
}
 0x33c   : > { %s2686_s9 = scalar_lea.hbm %s2325_s23, 128  ;;  %s2690_s24 = scalar_lea.hbm %s3585_s4, 256 }
 0x33d   : > { %p2687_p7 = scmp.ne.s32.totalorder %s2325_s23, %s2686_s9  ;;  %p2691_p9 = scmp.lt.s32.totalorder %s2325_s23, %s3585_s4 }
 0x33e   : > { %p2692_p11 = scmp.lt.s32.totalorder %s2690_s24, %s2686_s9 }
 0x33f   : > { %p2688_p4 = pnand %p2687_p7, %p2889_p13 }
 0x340   : > { %p2693_p12 = por %p2692_p11, %p2691_p9 }
 0x341   : > { %p2689_p6 = pneg %p2688_p4 }
 0x343   : > { %p2694_p1 = pnand %p2693_p12, %p2689_p6 }
 0x345   : > { %2697 = shalt.err (!%p2694_p1)
}
 0x346   : > { %2537 = dma.vmem_to_hbm [thread:$0]  (%p2889_p13), %s2328_s2, 128, %s2325_s23, %s2313_s25  }
 0x347 PF: > { %s2339_s29 = sand.u32 1, %s2736_s15   ;;  %p3603_p8 = scmp.ne.s32.totalorder %s3593_s26, 0 }
 0x348   : > { %p3604_p10 = scmp.ge.s32.totalorder %s2756_s20, 2  ;;  %s2340_s12 = scalar_lea.sflag [#allocation4], %s2339_s29 }
 0x34a   : > { %p2548_p0 = pnand %p3604_p10, %p3603_p8 }
 0x34c   : > { %p2549_p2 = pneg %p2548_p0 }
 0x34e   : > { %2731 = dma.done.wait (%p2549_p2), %s2340_s12, 128  }
 0x34f   : > { %2733 = vsyncadd (%p2549_p2), %s2340_s12, 4294967168  ;;  %s21_s20 = sadd.s32 1, %s2756_s20   ;;  %s3605_s15 = smov %s2740_s16 }
 0x350   : > { %p18_p3 = scmp.ge.s32.totalorder %s21_s20, 4   ;;  %s3606_s16 = smov %s2744_s17 }
 0x351   : > { %s3607_s17 = smov %s2898_s28  ;;  %s3608_s18 = smov %s2752_s19 }
 0x352   : > { %s3609_s19 = smov %s3611_s5  ;;  %20 = sbr.rel (!%p18_p3) target bundleno = 9 (0x9), region = 85 }
 0x357   :  { %2345 = vsyncpa [#allocation3], 1 }
 0x358   :  { %2347 = vsyncpa [#allocation3 + $0x1], 1 }
 0x359   :  { %2348 = vsyncpa [#allocation6], 1 }
 0x35a   :  { %2349 = vsyncpa [#allocation4], 1 }
 0x35b   :  { %2351 = vsyncpa [#allocation4 + $0x1], 1 }

</bundles_post_ra>
